<compile_context>
chip_gen: v5e
topology: v5e:2x2
jax: 0.10.0
libtpu: 0.0.40
codegen_flags: <defaults>
</compile_context>

<pallas_src>
import jax
import jax.numpy as jnp
from jax.experimental import pallas as pl
from jax.experimental.pallas import tpu as pltpu


def _identity_block_kernel(x_ref, w1_ref, w2_ref, w3_ref,
                           b1_ref, b2_ref, b3_ref, o_ref, pad_ref):
    # x_ref/o_ref: (NB, L, C).  w*_ref: (k, C, C) bf16, w[t] = tap-t (in, out).
    # b*_ref: (1, C) f32.  pad_ref: (NB, L+k-1, C) bf16 'same'-padded scratch.
    NB, L, C = x_ref.shape
    k = w1_ref.shape[0]
    p = (k - 1) // 2

    # Zero only the halo border rows (the interior is fully overwritten per conv).
    if p > 0:
        halo = jnp.zeros((NB, p, C), pad_ref.dtype)
        pad_ref[:, :p, :] = halo
        pad_ref[:, p + L:, :] = halo

    def conv1d_same(inp, w_ref, b_ref):
        # k accumulating per-tap MXU matmuls; no materialized im2col, operands
        # come straight from the bf16 halo scratch (no extra cast copy).
        pad_ref[:, p:p + L, :] = inp.astype(pad_ref.dtype)
        y = None
        for t in range(k):
            tap = pad_ref[:, t:t + L, :].reshape(NB * L, C)          # bf16
            d = jnp.dot(tap, w_ref[t], preferred_element_type=jnp.float32)
            y = d if y is None else y + d
        y = y + b_ref[...]                                           # (1, C) bias
        return y.reshape(NB, L, C)                                   # f32

    x = x_ref[...]                              # residual kept in input dtype
    h = jnp.maximum(conv1d_same(x, w1_ref, b1_ref), 0.0)
    h = jnp.maximum(conv1d_same(h, w2_ref, b2_ref), 0.0)
    h = conv1d_same(h, w3_ref, b3_ref)
    o_ref[...] = jnp.maximum(h + x.astype(jnp.float32), 0.0).astype(o_ref.dtype)


def _vmem_limit_bytes():
    """Per-generation VMEM request: ~96 MiB on v5e/v6e (128 MiB physical),
    ~48 MiB on v7x (64 MiB physical)."""
    try:
        cap = int(pltpu.get_tpu_info().vmem_capacity_bytes)
    except Exception:
        cap = 64 * 1024 * 1024            # conservative (v7x-sized) fallback
    return int(min((cap * 3) // 4, 96 * 1024 * 1024))


def _pick_batch_block(N, L, C, k, x_itemsize, budget):
    """Largest divisor-of-N batch block that fits `budget` bytes of VMEM while
    keeping >= 2 grid steps, preferring an even step count (v7x: 2 TCs)."""
    fixed = 3 * (k * C * C * 2 + C * 4)          # single-buffered weights + biases
    per_b = (2 * 2 * L * C * x_itemsize          # double-buffered in + out blocks
             + (L + k - 1) * C * 2               # bf16 halo scratch
             + L * C * x_itemsize                # live residual (input dtype)
             + 4 * L * C * 4)                    # f32 acc / per-tap product / temps
    nb_max = max(1, (budget - fixed) // per_b)
    feasible = [c for c in range(1, N + 1)
                if N % c == 0 and c <= nb_max and (N // c >= 2 or N < 2)]
    if not feasible:
        return 1
    even = [c for c in feasible if (N // c) % 2 == 0]
    return int(max(even) if even else max(feasible))


def _grid_invariant_spec(shape, index_map):
    """Single-buffer grid-invariant operands (constant index_map)."""
    try:
        return pl.BlockSpec(shape, index_map, pipeline_mode=pl.Buffered(1))
    except Exception:                       # older jax without pipeline_mode
        return pl.BlockSpec(shape, index_map)


def identity_block_nlc(x_nlc, w1, b1, w2, b2, w3, b3):
    """IdentityBlock on (N, L, C) activations (channels on the lane axis)."""
    N, L, C = x_nlc.shape
    k = w1.shape[2]
    assert k % 2 == 1, "only odd kernel sizes (symmetric 'same' padding)"
    assert w1.shape == (C, C, k)

    def taps(w):   # torch (out, in, k) -> (k, in, out) bf16 for the MXU
        return jnp.transpose(w, (2, 1, 0)).astype(jnp.bfloat16)

    w1t, w2t, w3t = taps(w1), taps(w2), taps(w3)
    b1k = b1[None, :].astype(jnp.float32)
    b2k = b2[None, :].astype(jnp.float32)
    b3k = b3[None, :].astype(jnp.float32)

    vmem_limit = _vmem_limit_bytes()
    nb = _pick_batch_block(N, L, C, k, x_nlc.dtype.itemsize,
                           budget=int(vmem_limit * 0.7))
    grid = (N // nb,)

    xspec = pl.BlockSpec((nb, L, C), lambda b: (b, 0, 0))
    wspec = _grid_invariant_spec((k, C, C), lambda b: (0, 0, 0))
    bspec = _grid_invariant_spec((1, C), lambda b: (0, 0))

    return pl.pallas_call(
        _identity_block_kernel,
        out_shape=jax.ShapeDtypeStruct((N, L, C), x_nlc.dtype),
        grid_spec=pltpu.PrefetchScalarGridSpec(
            num_scalar_prefetch=0,
            grid=grid,
            in_specs=[xspec, wspec, wspec, wspec, bspec, bspec, bspec],
            out_specs=xspec,
            scratch_shapes=[pltpu.VMEM((nb, L + k - 1, C), jnp.bfloat16)],
        ),
        compiler_params=pltpu.CompilerParams(
            dimension_semantics=("parallel",),
            vmem_limit_bytes=vmem_limit,
        ),
    )(x_nlc, w1t, w2t, w3t, b1k, b2k, b3k)


def identity_block(x_ncl, w1, b1, w2, b2, w3, b3):
    """PyTorch-layout entry: x (N, C, L), weights (C, C, k), biases (C,)."""
    # NOTE: these two transposes are full HBM read+writes; hot-path callers
    # should keep activations in NLC and call identity_block_nlc directly.
    out_nlc = identity_block_nlc(jnp.transpose(x_ncl, (0, 2, 1)),
                                 w1, b1, w2, b2, w3, b3)
    return jnp.transpose(out_nlc, (0, 2, 1))


# ---------------- pure-JAX reference (silent correctness check) --------------
def _ref_conv1d_same(x, w, b):
    p = (w.shape[2] - 1) // 2
    y = jax.lax.conv_general_dilated(
        x, w, window_strides=(1,), padding=[(p, p)],
        dimension_numbers=("NCH", "OIH", "NCH"))
    return y + b[None, :, None]


def _ref_identity_block(x, w1, b1, w2, b2, w3, b3):
    s = x
    x = jax.nn.relu(_ref_conv1d_same(x, w1, b1))
    x = jax.nn.relu(_ref_conv1d_same(x, w2, b2))
    x = _ref_conv1d_same(x, w3, b3)
    return jax.nn.relu(x + s)


if __name__ == "__main__":
    N, C, L, K = 4, 4, 16, 3   # batch, channels, sequence length, kernel size

    key = jax.random.PRNGKey(0)
    kx, k1, k2, k3, kb1, kb2, kb3 = jax.random.split(key, 7)

    x = jax.random.normal(kx, (N, C, L), dtype=jnp.float32)
    w1 = 0.1 * jax.random.normal(k1, (C, C, K), dtype=jnp.float32)
    w2 = 0.1 * jax.random.normal(k2, (C, C, K), dtype=jnp.float32)
    w3 = 0.1 * jax.random.normal(k3, (C, C, K), dtype=jnp.float32)
    b1 = 0.1 * jax.random.normal(kb1, (C,), dtype=jnp.float32)
    b2 = 0.1 * jax.random.normal(kb2, (C,), dtype=jnp.float32)
    b3 = 0.1 * jax.random.normal(kb3, (C,), dtype=jnp.float32)

    out = identity_block(x, w1, b1, w2, b2, w3, b3)
    out = jax.block_until_ready(out)

    ref = _ref_identity_block(x, w1, b1, w2, b2, w3, b3)
    assert out.shape == (N, C, L)
    # bf16 MXU operands (f32 accumulation) -> loosened tolerance vs f32 ref.
    assert jnp.allclose(out, ref, atol=3e-2, rtol=3e-2)

    print("KERNEL_OK")
</pallas_src>

<mosaic_0001>
module attributes {stable_mosaic.version = 11 : i64} {
  func.func @_identity_block_kernel(%arg0: i32, %arg1: memref<2x16x4xf32, #tpu.memory_space<vmem>>, %arg2: memref<3x4x4xbf16, #tpu.memory_space<vmem>>, %arg3: memref<3x4x4xbf16, #tpu.memory_space<vmem>>, %arg4: memref<3x4x4xbf16, #tpu.memory_space<vmem>>, %arg5: memref<1x4xf32, #tpu.memory_space<vmem>>, %arg6: memref<1x4xf32, #tpu.memory_space<vmem>>, %arg7: memref<1x4xf32, #tpu.memory_space<vmem>>, %arg8: memref<2x16x4xf32, #tpu.memory_space<vmem>>, %arg9: memref<2x18x4xbf16, #tpu.memory_space<vmem>>) attributes {dimension_semantics = [#tpu.dimension_semantics<parallel>], iteration_bounds = array<i64: 2>, scalar_prefetch = 0 : i64, scratch_operands = 1 : i64, tpu.core_type = #tpu.core_type<tc>, window_params = [{transform_indices = @transform_0, window_bounds = array<i64: 2, 16, 4>}, {pipeline_mode = #tpu.pipeline_mode<synchronous>, transform_indices = @transform_1, window_bounds = array<i64: 3, 4, 4>}, {pipeline_mode = #tpu.pipeline_mode<synchronous>, transform_indices = @transform_2, window_bounds = array<i64: 3, 4, 4>}, {pipeline_mode = #tpu.pipeline_mode<synchronous>, transform_indices = @transform_3, window_bounds = array<i64: 3, 4, 4>}, {pipeline_mode = #tpu.pipeline_mode<synchronous>, transform_indices = @transform_4, window_bounds = array<i64: 1, 4>}, {pipeline_mode = #tpu.pipeline_mode<synchronous>, transform_indices = @transform_5, window_bounds = array<i64: 1, 4>}, {pipeline_mode = #tpu.pipeline_mode<synchronous>, transform_indices = @transform_6, window_bounds = array<i64: 1, 4>}, {transform_indices = @transform_7, window_bounds = array<i64: 2, 16, 4>}]} {
    %cst = arith.constant 0.000000e+00 : bf16
    %0 = vector.broadcast %cst : bf16 to vector<2x1x4xbf16>
    %c0 = arith.constant 0 : index
    %c0_0 = arith.constant 0 : index
    %c0_1 = arith.constant 0 : index
    %1 = vector.load %arg9[%c0, %c0_0, %c0_1] : memref<2x18x4xbf16, #tpu.memory_space<vmem>>, vector<2x1x4xbf16>
    tpu.vector_store %arg9[%c0, %c0_0, %c0_1], %0 {strides = array<i32>} : memref<2x18x4xbf16, #tpu.memory_space<vmem>>, vector<2x1x4xbf16>,
    %c0_2 = arith.constant 0 : index
    %c17 = arith.constant 17 : index
    %c0_3 = arith.constant 0 : index
    %2 = vector.load %arg9[%c0_2, %c17, %c0_3] : memref<2x18x4xbf16, #tpu.memory_space<vmem>>, vector<2x1x4xbf16>
    tpu.vector_store %arg9[%c0_2, %c17, %c0_3], %0 {strides = array<i32>} : memref<2x18x4xbf16, #tpu.memory_space<vmem>>, vector<2x1x4xbf16>,
    %c0_4 = arith.constant 0 : index
    %c0_5 = arith.constant 0 : index
    %c0_6 = arith.constant 0 : index
    %3 = vector.load %arg1[%c0_4, %c0_5, %c0_6] : memref<2x16x4xf32, #tpu.memory_space<vmem>>, vector<2x16x4xf32>
    %4 = arith.truncf %3 : vector<2x16x4xf32> to vector<2x16x4xbf16>
    %c0_7 = arith.constant 0 : index
    %c1 = arith.constant 1 : index
    %c0_8 = arith.constant 0 : index
    %5 = vector.load %arg9[%c0_7, %c1, %c0_8] : memref<2x18x4xbf16, #tpu.memory_space<vmem>>, vector<2x16x4xbf16>
    tpu.vector_store %arg9[%c0_7, %c1, %c0_8], %4 {strides = array<i32>} : memref<2x18x4xbf16, #tpu.memory_space<vmem>>, vector<2x16x4xbf16>,
    %c0_9 = arith.constant 0 : index
    %c0_10 = arith.constant 0 : index
    %c0_11 = arith.constant 0 : index
    %6 = vector.load %arg9[%c0_9, %c0_10, %c0_11] : memref<2x18x4xbf16, #tpu.memory_space<vmem>>, vector<2x16x4xbf16>
    %7 = vector.shape_cast %6 : vector<2x16x4xbf16> to vector<32x4xbf16>
    %c0_12 = arith.constant 0 : index
    %c0_13 = arith.constant 0 : index
    %c0_14 = arith.constant 0 : index
    %8 = vector.load %arg2[%c0_12, %c0_13, %c0_14] : memref<3x4x4xbf16, #tpu.memory_space<vmem>>, vector<1x4x4xbf16>
    %9 = vector.shape_cast %8 : vector<1x4x4xbf16> to vector<4x4xbf16>
    %cst_15 = arith.constant dense<0.000000e+00> : vector<32x4xf32>
    %10 = tpu.matmul %7, %9, %cst_15 {dimension_numbers = #tpu.dot_dimension_numbers<[1], [0], [0], [1], [0, 0, 1, 1], [], []>} : vector<32x4xbf16>, vector<4x4xbf16>, vector<32x4xf32> -> vector<32x4xf32>
    %c0_16 = arith.constant 0 : index
    %c1_17 = arith.constant 1 : index
    %c0_18 = arith.constant 0 : index
    %11 = vector.load %arg9[%c0_16, %c1_17, %c0_18] : memref<2x18x4xbf16, #tpu.memory_space<vmem>>, vector<2x16x4xbf16>
    %12 = vector.shape_cast %11 : vector<2x16x4xbf16> to vector<32x4xbf16>
    %c1_19 = arith.constant 1 : index
    %c0_20 = arith.constant 0 : index
    %c0_21 = arith.constant 0 : index
    %13 = vector.load %arg2[%c1_19, %c0_20, %c0_21] : memref<3x4x4xbf16, #tpu.memory_space<vmem>>, vector<1x4x4xbf16>
    %14 = vector.shape_cast %13 : vector<1x4x4xbf16> to vector<4x4xbf16>
    %cst_22 = arith.constant dense<0.000000e+00> : vector<32x4xf32>
    %15 = tpu.matmul %12, %14, %cst_22 {dimension_numbers = #tpu.dot_dimension_numbers<[1], [0], [0], [1], [0, 0, 1, 1], [], []>} : vector<32x4xbf16>, vector<4x4xbf16>, vector<32x4xf32> -> vector<32x4xf32>
    %16 = arith.addf %10, %15 : vector<32x4xf32>
    %c0_23 = arith.constant 0 : index
    %c2 = arith.constant 2 : index
    %c0_24 = arith.constant 0 : index
    %17 = vector.load %arg9[%c0_23, %c2, %c0_24] : memref<2x18x4xbf16, #tpu.memory_space<vmem>>, vector<2x16x4xbf16>
    %18 = vector.shape_cast %17 : vector<2x16x4xbf16> to vector<32x4xbf16>
    %c2_25 = arith.constant 2 : index
    %c0_26 = arith.constant 0 : index
    %c0_27 = arith.constant 0 : index
    %19 = vector.load %arg2[%c2_25, %c0_26, %c0_27] : memref<3x4x4xbf16, #tpu.memory_space<vmem>>, vector<1x4x4xbf16>
    %20 = vector.shape_cast %19 : vector<1x4x4xbf16> to vector<4x4xbf16>
    %cst_28 = arith.constant dense<0.000000e+00> : vector<32x4xf32>
    %21 = tpu.matmul %18, %20, %cst_28 {dimension_numbers = #tpu.dot_dimension_numbers<[1], [0], [0], [1], [0, 0, 1, 1], [], []>} : vector<32x4xbf16>, vector<4x4xbf16>, vector<32x4xf32> -> vector<32x4xf32>
    %22 = arith.addf %16, %21 : vector<32x4xf32>
    %c0_29 = arith.constant 0 : index
    %c0_30 = arith.constant 0 : index
    %23 = vector.load %arg5[%c0_29, %c0_30] : memref<1x4xf32, #tpu.memory_space<vmem>>, vector<1x4xf32>
    %24 = vector.broadcast %23 : vector<1x4xf32> to vector<32x4xf32>
    %25 = arith.addf %22, %24 : vector<32x4xf32>
    %26 = vector.shape_cast %25 : vector<32x4xf32> to vector<2x16x4xf32>
    %cst_31 = arith.constant 0.000000e+00 : f32
    %27 = vector.broadcast %cst_31 : f32 to vector<2x16x4xf32>
    %28 = arith.maximumf %26, %27 : vector<2x16x4xf32>
    %29 = arith.truncf %28 : vector<2x16x4xf32> to vector<2x16x4xbf16>
    %c0_32 = arith.constant 0 : index
    %c1_33 = arith.constant 1 : index
    %c0_34 = arith.constant 0 : index
    %30 = vector.load %arg9[%c0_32, %c1_33, %c0_34] : memref<2x18x4xbf16, #tpu.memory_space<vmem>>, vector<2x16x4xbf16>
    tpu.vector_store %arg9[%c0_32, %c1_33, %c0_34], %29 {strides = array<i32>} : memref<2x18x4xbf16, #tpu.memory_space<vmem>>, vector<2x16x4xbf16>,
    %c0_35 = arith.constant 0 : index
    %c0_36 = arith.constant 0 : index
    %c0_37 = arith.constant 0 : index
    %31 = vector.load %arg9[%c0_35, %c0_36, %c0_37] : memref<2x18x4xbf16, #tpu.memory_space<vmem>>, vector<2x16x4xbf16>
    %32 = vector.shape_cast %31 : vector<2x16x4xbf16> to vector<32x4xbf16>
    %c0_38 = arith.constant 0 : index
    %c0_39 = arith.constant 0 : index
    %c0_40 = arith.constant 0 : index
    %33 = vector.load %arg3[%c0_38, %c0_39, %c0_40] : memref<3x4x4xbf16, #tpu.memory_space<vmem>>, vector<1x4x4xbf16>
    %34 = vector.shape_cast %33 : vector<1x4x4xbf16> to vector<4x4xbf16>
    %cst_41 = arith.constant dense<0.000000e+00> : vector<32x4xf32>
    %35 = tpu.matmul %32, %34, %cst_41 {dimension_numbers = #tpu.dot_dimension_numbers<[1], [0], [0], [1], [0, 0, 1, 1], [], []>} : vector<32x4xbf16>, vector<4x4xbf16>, vector<32x4xf32> -> vector<32x4xf32>
    %c0_42 = arith.constant 0 : index
    %c1_43 = arith.constant 1 : index
    %c0_44 = arith.constant 0 : index
    %36 = vector.load %arg9[%c0_42, %c1_43, %c0_44] : memref<2x18x4xbf16, #tpu.memory_space<vmem>>, vector<2x16x4xbf16>
    %37 = vector.shape_cast %36 : vector<2x16x4xbf16> to vector<32x4xbf16>
    %c1_45 = arith.constant 1 : index
    %c0_46 = arith.constant 0 : index
    %c0_47 = arith.constant 0 : index
    %38 = vector.load %arg3[%c1_45, %c0_46, %c0_47] : memref<3x4x4xbf16, #tpu.memory_space<vmem>>, vector<1x4x4xbf16>
    %39 = vector.shape_cast %38 : vector<1x4x4xbf16> to vector<4x4xbf16>
    %cst_48 = arith.constant dense<0.000000e+00> : vector<32x4xf32>
    %40 = tpu.matmul %37, %39, %cst_48 {dimension_numbers = #tpu.dot_dimension_numbers<[1], [0], [0], [1], [0, 0, 1, 1], [], []>} : vector<32x4xbf16>, vector<4x4xbf16>, vector<32x4xf32> -> vector<32x4xf32>
    %41 = arith.addf %35, %40 : vector<32x4xf32>
    %c0_49 = arith.constant 0 : index
    %c2_50 = arith.constant 2 : index
    %c0_51 = arith.constant 0 : index
    %42 = vector.load %arg9[%c0_49, %c2_50, %c0_51] : memref<2x18x4xbf16, #tpu.memory_space<vmem>>, vector<2x16x4xbf16>
    %43 = vector.shape_cast %42 : vector<2x16x4xbf16> to vector<32x4xbf16>
    %c2_52 = arith.constant 2 : index
    %c0_53 = arith.constant 0 : index
    %c0_54 = arith.constant 0 : index
    %44 = vector.load %arg3[%c2_52, %c0_53, %c0_54] : memref<3x4x4xbf16, #tpu.memory_space<vmem>>, vector<1x4x4xbf16>
    %45 = vector.shape_cast %44 : vector<1x4x4xbf16> to vector<4x4xbf16>
    %cst_55 = arith.constant dense<0.000000e+00> : vector<32x4xf32>
    %46 = tpu.matmul %43, %45, %cst_55 {dimension_numbers = #tpu.dot_dimension_numbers<[1], [0], [0], [1], [0, 0, 1, 1], [], []>} : vector<32x4xbf16>, vector<4x4xbf16>, vector<32x4xf32> -> vector<32x4xf32>
    %47 = arith.addf %41, %46 : vector<32x4xf32>
    %c0_56 = arith.constant 0 : index
    %c0_57 = arith.constant 0 : index
    %48 = vector.load %arg6[%c0_56, %c0_57] : memref<1x4xf32, #tpu.memory_space<vmem>>, vector<1x4xf32>
    %49 = vector.broadcast %48 : vector<1x4xf32> to vector<32x4xf32>
    %50 = arith.addf %47, %49 : vector<32x4xf32>
    %51 = vector.shape_cast %50 : vector<32x4xf32> to vector<2x16x4xf32>
    %cst_58 = arith.constant 0.000000e+00 : f32
    %52 = vector.broadcast %cst_58 : f32 to vector<2x16x4xf32>
    %53 = arith.maximumf %51, %52 : vector<2x16x4xf32>
    %54 = arith.truncf %53 : vector<2x16x4xf32> to vector<2x16x4xbf16>
    %c0_59 = arith.constant 0 : index
    %c1_60 = arith.constant 1 : index
    %c0_61 = arith.constant 0 : index
    %55 = vector.load %arg9[%c0_59, %c1_60, %c0_61] : memref<2x18x4xbf16, #tpu.memory_space<vmem>>, vector<2x16x4xbf16>
    tpu.vector_store %arg9[%c0_59, %c1_60, %c0_61], %54 {strides = array<i32>} : memref<2x18x4xbf16, #tpu.memory_space<vmem>>, vector<2x16x4xbf16>,
    %c0_62 = arith.constant 0 : index
    %c0_63 = arith.constant 0 : index
    %c0_64 = arith.constant 0 : index
    %56 = vector.load %arg9[%c0_62, %c0_63, %c0_64] : memref<2x18x4xbf16, #tpu.memory_space<vmem>>, vector<2x16x4xbf16>
    %57 = vector.shape_cast %56 : vector<2x16x4xbf16> to vector<32x4xbf16>
    %c0_65 = arith.constant 0 : index
    %c0_66 = arith.constant 0 : index
    %c0_67 = arith.constant 0 : index
    %58 = vector.load %arg4[%c0_65, %c0_66, %c0_67] : memref<3x4x4xbf16, #tpu.memory_space<vmem>>, vector<1x4x4xbf16>
    %59 = vector.shape_cast %58 : vector<1x4x4xbf16> to vector<4x4xbf16>
    %cst_68 = arith.constant dense<0.000000e+00> : vector<32x4xf32>
    %60 = tpu.matmul %57, %59, %cst_68 {dimension_numbers = #tpu.dot_dimension_numbers<[1], [0], [0], [1], [0, 0, 1, 1], [], []>} : vector<32x4xbf16>, vector<4x4xbf16>, vector<32x4xf32> -> vector<32x4xf32>
    %c0_69 = arith.constant 0 : index
    %c1_70 = arith.constant 1 : index
    %c0_71 = arith.constant 0 : index
    %61 = vector.load %arg9[%c0_69, %c1_70, %c0_71] : memref<2x18x4xbf16, #tpu.memory_space<vmem>>, vector<2x16x4xbf16>
    %62 = vector.shape_cast %61 : vector<2x16x4xbf16> to vector<32x4xbf16>
    %c1_72 = arith.constant 1 : index
    %c0_73 = arith.constant 0 : index
    %c0_74 = arith.constant 0 : index
    %63 = vector.load %arg4[%c1_72, %c0_73, %c0_74] : memref<3x4x4xbf16, #tpu.memory_space<vmem>>, vector<1x4x4xbf16>
    %64 = vector.shape_cast %63 : vector<1x4x4xbf16> to vector<4x4xbf16>
    %cst_75 = arith.constant dense<0.000000e+00> : vector<32x4xf32>
    %65 = tpu.matmul %62, %64, %cst_75 {dimension_numbers = #tpu.dot_dimension_numbers<[1], [0], [0], [1], [0, 0, 1, 1], [], []>} : vector<32x4xbf16>, vector<4x4xbf16>, vector<32x4xf32> -> vector<32x4xf32>
    %66 = arith.addf %60, %65 : vector<32x4xf32>
    %c0_76 = arith.constant 0 : index
    %c2_77 = arith.constant 2 : index
    %c0_78 = arith.constant 0 : index
    %67 = vector.load %arg9[%c0_76, %c2_77, %c0_78] : memref<2x18x4xbf16, #tpu.memory_space<vmem>>, vector<2x16x4xbf16>
    %68 = vector.shape_cast %67 : vector<2x16x4xbf16> to vector<32x4xbf16>
    %c2_79 = arith.constant 2 : index
    %c0_80 = arith.constant 0 : index
    %c0_81 = arith.constant 0 : index
    %69 = vector.load %arg4[%c2_79, %c0_80, %c0_81] : memref<3x4x4xbf16, #tpu.memory_space<vmem>>, vector<1x4x4xbf16>
    %70 = vector.shape_cast %69 : vector<1x4x4xbf16> to vector<4x4xbf16>
    %cst_82 = arith.constant dense<0.000000e+00> : vector<32x4xf32>
    %71 = tpu.matmul %68, %70, %cst_82 {dimension_numbers = #tpu.dot_dimension_numbers<[1], [0], [0], [1], [0, 0, 1, 1], [], []>} : vector<32x4xbf16>, vector<4x4xbf16>, vector<32x4xf32> -> vector<32x4xf32>
    %72 = arith.addf %66, %71 : vector<32x4xf32>
    %c0_83 = arith.constant 0 : index
    %c0_84 = arith.constant 0 : index
    %73 = vector.load %arg7[%c0_83, %c0_84] : memref<1x4xf32, #tpu.memory_space<vmem>>, vector<1x4xf32>
    %74 = vector.broadcast %73 : vector<1x4xf32> to vector<32x4xf32>
    %75 = arith.addf %72, %74 : vector<32x4xf32>
    %76 = vector.shape_cast %75 : vector<32x4xf32> to vector<2x16x4xf32>
    %77 = arith.addf %76, %3 : vector<2x16x4xf32>
    %cst_85 = arith.constant 0.000000e+00 : f32
    %78 = vector.broadcast %cst_85 : f32 to vector<2x16x4xf32>
    %79 = arith.maximumf %77, %78 : vector<2x16x4xf32>
    %c0_86 = arith.constant 0 : index
    %c0_87 = arith.constant 0 : index
    %c0_88 = arith.constant 0 : index
    %80 = vector.load %arg8[%c0_86, %c0_87, %c0_88] : memref<2x16x4xf32, #tpu.memory_space<vmem>>, vector<2x16x4xf32>
    tpu.vector_store %arg8[%c0_86, %c0_87, %c0_88], %79 {strides = array<i32>} : memref<2x16x4xf32, #tpu.memory_space<vmem>>, vector<2x16x4xf32>,
    return
  }
  func.func @transform_0(%arg0: i32) -> (i32, i32, i32) {
    %c0_i32 = arith.constant 0 : i32
    %c0_i32_0 = arith.constant 0 : i32
    %c0_i32_1 = arith.constant 0 : i32
    return %arg0, %c0_i32, %c0_i32_0 : i32, i32, i32
  }
  func.func @transform_1(%arg0: i32) -> (i32, i32, i32) {
    %c0_i32 = arith.constant 0 : i32
    %c0_i32_0 = arith.constant 0 : i32
    %c0_i32_1 = arith.constant 0 : i32
    %c0_i32_2 = arith.constant 0 : i32
    return %c0_i32, %c0_i32_0, %c0_i32_1 : i32, i32, i32
  }
  func.func @transform_2(%arg0: i32) -> (i32, i32, i32) {
    %c0_i32 = arith.constant 0 : i32
    %c0_i32_0 = arith.constant 0 : i32
    %c0_i32_1 = arith.constant 0 : i32
    %c0_i32_2 = arith.constant 0 : i32
    return %c0_i32, %c0_i32_0, %c0_i32_1 : i32, i32, i32
  }
  func.func @transform_3(%arg0: i32) -> (i32, i32, i32) {
    %c0_i32 = arith.constant 0 : i32
    %c0_i32_0 = arith.constant 0 : i32
    %c0_i32_1 = arith.constant 0 : i32
    %c0_i32_2 = arith.constant 0 : i32
    return %c0_i32, %c0_i32_0, %c0_i32_1 : i32, i32, i32
  }
  func.func @transform_4(%arg0: i32) -> (i32, i32) {
    %c0_i32 = arith.constant 0 : i32
    %c0_i32_0 = arith.constant 0 : i32
    %c0_i32_1 = arith.constant 0 : i32
    return %c0_i32, %c0_i32_0 : i32, i32
  }
  func.func @transform_5(%arg0: i32) -> (i32, i32) {
    %c0_i32 = arith.constant 0 : i32
    %c0_i32_0 = arith.constant 0 : i32
    %c0_i32_1 = arith.constant 0 : i32
    return %c0_i32, %c0_i32_0 : i32, i32
  }
  func.func @transform_6(%arg0: i32) -> (i32, i32) {
    %c0_i32 = arith.constant 0 : i32
    %c0_i32_0 = arith.constant 0 : i32
    %c0_i32_1 = arith.constant 0 : i32
    return %c0_i32, %c0_i32_0 : i32, i32
  }
  func.func @transform_7(%arg0: i32) -> (i32, i32, i32) {
    %c0_i32 = arith.constant 0 : i32
    %c0_i32_0 = arith.constant 0 : i32
    %c0_i32_1 = arith.constant 0 : i32
    return %arg0, %c0_i32, %c0_i32_0 : i32, i32, i32
  }
}

</mosaic_0001>

<bundles_post_ra>
// kernel: tpu_custom_call.1
= control target key start
LH: loop header
LB: loop body
LE: loop exit
PB: predicated region body
PF: predicated region fallthrough
CT: control target
= control target key end

     0   :  { %s1298_s24 = smov 0   ;;  %s1558_s0 = inlined_call_operand.vmem [shape: f32[4,16,4], index: 0, kind: input, shape index: {}]   ;;  %s1559_s1 = inlined_call_operand.vmem [shape: bf16[3,4,4], index: 1, kind: input, shape index: {}]   ;;  %s1560_s2 = inlined_call_operand.vmem [shape: bf16[3,4,4], index: 2, kind: input, shape index: {}]   ;;  %s1561_s3 = inlined_call_operand.vmem [shape: bf16[3,4,4], index: 3, kind: input, shape index: {}]   ;;  %s1562_s4 = inlined_call_operand.vmem [shape: f32[1,4], index: 4, kind: input, shape index: {}]   ;;  %s1563_s5 = inlined_call_operand.vmem [shape: f32[1,4], index: 5, kind: input, shape index: {}]   ;;  %s1564_s6 = inlined_call_operand.vmem [shape: f32[1,4], index: 6, kind: input, shape index: {}]   ;;  %s1565_s7 = inlined_call_operand.vmem [shape: f32[4,16,4], index: 7, kind: output, shape index: {}]  }
   0x1 LB: > { %s1163_s25 = sadd.s32 4294967295, %s1256_s24   ;;  %p1167_p0 = scmp.ge.s32.totalorder %s1256_s24, 1  ;;  %s1256_s24 = sphi %s1298_s24, %s17_s24  }
   0x2   : > { %p239_p1 = scmp.lt.s32.totalorder %s1256_s24, 3 }
   0x4   : > { %p240_p2 = pnand %p1167_p0, %p239_p1 }
   0x5   : > { %s1168_s28 = sshll.u32 (!%p240_p2), %s1163_s25, 1 }
   0x6   : > { %243 = sbr.rel (%p240_p2) target bundleno = 585 (0x249), region = 48  ;;  %p274_p3 = scmp.lt.s32.totalorder (!%p240_p2), %s1168_s28, 3 }
   0xb   : > { %v1174_v0 = vld [vmem:[%s1559_s1 + $0x2] sm:$0x3]  ;;  %vm445_vm0 = vcmask 1041408   ;;  %vm288_vm1 = vcmask 24576   ;;  %vm289_vm2 = vsmask.f32 256 }
   0xc   : > { %v447_v1 = vsel %vm445_vm0, %v1174_v0, 0  ;;  %v294_v2 = vld [vmem:[#allocation2 + $0xc] sm:$0x1]  ;;  %vm1311_vm3 = vmand %vm288_vm1, %vm289_vm2  ;;  %vm297_vm4 = vsmask.f32 7938  ;;  %s1579_s28 = smov (!%p274_p3, %s1168_s28), 3 }
   0xd   : > { %1238 = vmatpush.bf16.msra.mxu1 %v447_v1  ;;  %v302_v4 = vld [vmem:[#allocation2 + $0x14] sm:$0x1]  ;;  %456 = vmatpush.bf16.msra.mxu0 %v447_v1  ;;  %v295_v5 = vsel %vm1311_vm3, 0, %v294_v2  ;;  %vm1320_vm5 = vmand %vm288_vm1, %vm297_vm4  ;;  %v291_v8 = vld [vmem:[#allocation2] sm:$0x1]  ;;  %s1230_s29 = sshll.u32 %s1579_s28, 4 }
   0xe   : > { %296 = vst [vmem:[#allocation2 + $0xc] sm:$0x1] %v295_v5  ;;  %v303_v7 = vsel %vm1320_vm5, 0, %v302_v4  ;;  %vm313_vm6 = vsmask.f32 4368  ;;  %v292_v9 = vsel %vm1311_vm3, 0, %v291_v8  ;;  %s278_s9 = scalar_lea.vmem %s1558_s0, %s1230_s29  ;;  %s285_s14 = scalar_lea.vmem %s1565_s7, %s1230_s29 }
   0xf   : > { %304 = vst [vmem:[#allocation2 + $0x14] sm:$0x1] %v303_v7  ;;  %v1189_v10 = vld [vmem:[%s1559_s1 + $0x4] sm:$0x3]  ;;  %v299_v11 = vld [vmem:[#allocation2 + $0x8] sm:$0x1]  ;;  %vm1362_vm8 = vmor %vm289_vm2, %vm313_vm6 }
  0x10   : > { %293 = vst [vmem:[#allocation2] sm:$0x1] %v292_v9  ;;  %v1337_v12 = vld [vmem:[%s278_s9 + $0x10] sm:$0xff]  ;;  %v1339_v13 = vld [vmem:[%s278_s9 + $0x18] sm:$0xff]  ;;  %v376_v14 = vld [vmem:[%s1559_s1] sm:$0x3] }
  0x11   : > { %v544_v15 = vsel %vm445_vm0, %v1189_v10, 0  ;;  %v300_v16 = vsel %vm1320_vm5, 0, %v299_v11  ;;  %v311_v17 = vpack.c.bf16 %v1337_v12, %v1337_v12  ;;  %v312_v18 = vpack.c.bf16 %v1339_v13, %v1339_v13  ;;  %v1352_v20 = vld [vmem:[%s278_s9] sm:$0xff]  ;;  %v1354_v21 = vld [vmem:[%s278_s9 + $0x8] sm:$0xff] }
  0x12   : > { %vm355_vm7 = vcmask 27648   ;;  %v485_v19 = vsel %vm445_vm0, %v376_v14, 0  ;;  %553 = vmatpush.bf16.msra.mxu2 %v544_v15  ;;  %301 = vst [vmem:[#allocation2 + $0x8] sm:$0x1] %v300_v16  ;;  %v309_v22 = vpack.c.bf16 %v1352_v20, %v1352_v20  ;;  %v310_v23 = vpack.c.bf16 %v1354_v21, %v1354_v21 }
  0x13   : > { %494 = vmatpush.bf16.msrb.mxu1 %v485_v19  ;;  %v333_v24 = vshrl.u32 %v311_v17, 16  ;;  %v336_v25 = vshll.u32 %v311_v17, 16  ;;  %v341_v26 = vshrl.u32 %v312_v18, 16  ;;  %v344_v27 = vshll.u32 %v312_v18, 16  ;;  %vm1368_vm9 = vmand %vm355_vm7, %vm297_vm4 }
  0x14   : > { %v316_v28 = vshrl.u32 %v309_v22, 16  ;;  %v319_v29 = vshll.u32 %v309_v22, 16  ;;  %v324_v30 = vshrl.u32 %v310_v23, 16  ;;  %v327_v31 = vshll.u32 %v310_v23, 16 }
  0x15   : > { %v335_v33 = vrot.slane %v333_v24, 7  ;;  %v343_v34 = vrot.slane %v341_v26, 7  ;;  %v365_v36 = vld [vmem:[#allocation2 + $0xc] sm:$0xf]  ;;  %vm379_vm10 = vsmask.f32 3328 }
  0x16   : > { %v369_v37 = vld [vmem:[#allocation2 + $0x14] sm:$0x1]  ;;  %v318_v38 = vrot.slane %v316_v28, 7  ;;  %v326_v39 = vrot.slane %v324_v30, 7  ;;  %vm512_vm11 = vcmask 1042432   ;;  %vm513_vm12 = vcmask 1046532  }
  0x17   : > { %v338_v40 = vor.u32 %v336_v25, %v335_v33  ;;  %v339_v41 = vrot.slane %v335_v33, 4  ;;  %v346_v42 = vor.u32 %v344_v27, %v343_v34  ;;  %v348_v43 = vrot.slane %v343_v34, 4  ;;  %v357_v44 = vld [vmem:[#allocation2] sm:$0xf]  ;;  %vm1393_vm14 = vmor %vm512_vm11, %vm513_vm12 }
  0x18   : > { %v321_v45 = vor.u32 %v319_v29, %v318_v38  ;;  %v322_v46 = vrot.slane %v318_v38, 4  ;;  %v329_v47 = vor.u32 %v327_v31, %v326_v39  ;;  %v331_v48 = vrot.slane %v326_v39, 4 }
  0x19   : > { %v347_v49 = vsel %vm1362_vm8, %v339_v41, %v346_v42  ;;  %v366_v50 = vsel %vm1368_vm9, %v338_v40, %v365_v36  ;;  %v370_v51 = vsel %vm1311_vm3, %v348_v43, %v369_v37  ;;  %v362_v52 = vld [vmem:[#allocation2 + $0x8] sm:$0x1]  ;;  %vm380_vm13 = vsmask.f32 7440 }
  0x1a   : > { %367 = vst [vmem:[#allocation2 + $0xc] sm:$0xf] %v366_v50  ;;  %v358_v53 = vsel %vm1368_vm9, %v321_v45, %v357_v44  ;;  %v330_v54 = vsel %vm1362_vm8, %v322_v46, %v329_v47  ;;  %v363_v55 = vsel %vm1311_vm3, %v331_v48, %v362_v52  ;;  %vm1401_vm15 = vmor %vm379_vm10, %vm380_vm13  ;;  %vm438_vm1 = vcmask 31744  }
  0x1b   : > { %368 = vst.msk [vmem:[#allocation2 + $0x10] sm:$0xf] %vm355_vm7, %v347_v49 }
  0x1c   : > { %371 = vst [vmem:[#allocation2 + $0x14] sm:$0x1] %v370_v51 }
  0x1d   : > { %359 = vst [vmem:[#allocation2] sm:$0xf] %v358_v53 }
  0x1e   : > { %361 = vst.msk [vmem:[#allocation2 + $0x4] sm:$0xf] %vm355_vm7, %v330_v54 }
  0x1f   : > { %364 = vst [vmem:[#allocation2 + $0x8] sm:$0x1] %v363_v55 }
  0x21   : > { %v374_v56 = vld [vmem:[#allocation2 + $0xc] sm:$0xf] }
  0x22   : > { %v1386_v57 = vld [vmem:[#allocation2 + $0x10] sm:$0xf]  ;;  %v407_v58 = vshrl.u32 %v374_v56, 16  ;;  %v410_v59 = vshll.u32 %v374_v56, 16  ;;  %v507_v47 = vld [vmem:[#allocation2 + $0xc] sm:$0xe] }
  0x23   : > { %v1388_v60 = vld [vmem:[#allocation2 + $0x14] sm:$0x1]  ;;  %v416_v61 = vshll.u32 %v1386_v57, 16  ;;  %v420_v62 = vshrl.u32 %v1386_v57, 16  ;;  %v524_v44 = vrot.slane %v1386_v57, 5  ;;  %v1188_v53 = vrot.slane %v507_v47, 9 }
  0x24   : > { %v409_v63 = vrot.slane %v407_v58, 4  ;;  %v412_v0 = vrot.slane %v410_v59, 5  ;;  %v426_v1 = vshll.u32 %v1388_v60, 16  ;;  %v506_v2 = vld [vmem:[#allocation2] sm:$0xe]  ;;  %v527_v55 = vrot.slane %v1388_v60, 5 }
  0x25   : > { %v418_v4 = vrot.slane %v416_v61, 5  ;;  %v422_v5 = vrot.slane %v420_v62, 4  ;;  %v373_v6 = vld [vmem:[#allocation2 + $0x4] sm:$0xf]  ;;  %v1187_v8 = vrot.slane %v506_v2, 9  ;;  %v526_v54 = vrot.slane %v524_v44, 4 }
  0x26   : > { %v413_v9 = vor.u32 %v412_v0, %v409_v63  ;;  %v428_v10 = vrot.slane %v426_v1, 5  ;;  %v377_v11 = vld [vmem:[#allocation2 + $0x8] sm:$0x1]  ;;  %v517_v14 = vrot.slane %v373_v6, 5  ;;  %v1397_v15 = vld [vmem:[#allocation2] sm:$0xf]  ;;  %v525_v59 = vsel %vm1393_vm14, %v1188_v53, %v524_v44 }
  0x27   : > { %v423_v17 = vor.u32 %v422_v5, %v418_v4  ;;  %v520_v18 = vrot.slane %v377_v11, 5  ;;  %v383_v19 = vshrl.u32 %v1397_v15, 16  ;;  %v386_v22 = vshll.u32 %v1397_v15, 16  ;;  %v1232_v2 = vld [vmem:[#allocation2] sm:$0xff]  ;;  %v1233_v60 = vld [vmem:[#allocation2 + $0xc] sm:$0xff] }
  0x28   : > { %v414_v23 = vrot.slane %v413_v9, 4  ;;  %v518_v24 = vsel %vm1393_vm14, %v1187_v8, %v517_v14  ;;  %v519_v25 = vrot.slane %v517_v14, 4  ;;  %v392_v26 = vshll.u32 %v373_v6, 16  ;;  %v642_v9 = vld [vmem:[%s1560_s2] sm:$0x3] }
  0x29   : > { %v424_v27 = vrot.slane %v423_v17, 4  ;;  %v531_v28 = vunpack.c.l.b16 %v518_v24  ;;  %v385_v29 = vrot.slane %v383_v19, 4  ;;  %v388_v30 = vrot.slane %v386_v22, 5  ;;  %v1247_v17 = vld [vmem:[%s1562_s4] ss:$0 sm:$0xff] }
  0x2a   : > { %v419_v31 = vsel %vm1401_vm15, %v414_v23, %v418_v4  ;;  %v521_v33 = vsel %vm1393_vm14, %v519_v25, %v520_v18  ;;  %v394_v34 = vrot.slane %v392_v26, 5  ;;  %v396_v36 = vshrl.u32 %v373_v6, 16  ;;  %v1207_v18 = vld [vmem:[%s1560_s2 + $0x4] sm:$0x3] }
  0x2b   : > { %v429_v37 = vsel %vm1401_vm15, %v424_v27, %v428_v10  ;;  %v434_v38 = vunpack.c.l.b16 %v419_v31  ;;  %v532_v39 = vunpack.c.l.b16 %v521_v33  ;;  %v389_v40 = vor.u32 %v388_v30, %v385_v29  ;;  %v1192_v33 = vld [vmem:[%s1560_s2 + $0x2] sm:$0x3] }
  0x2c   : > { %v435_v41 = vunpack.c.l.b16 %v429_v37  ;;  %v398_v42 = vrot.slane %v396_v36, 4  ;;  %v402_v43 = vshll.u32 %v377_v11, 16  ;;  %v528_v61 = vsel %vm1393_vm14, %v526_v54, %v527_v55 }
  0x2d   : > { %v535_v45 = vpack.c.b16 %v532_v39, %v531_v28  ;;  %v390_v46 = vrot.slane %v389_v40, 4  ;;  %v533_v63 = vunpack.c.l.b16 %v525_v59  ;;  %v534_v0 = vunpack.c.l.b16 %v528_v61 }
  0x2e   : > { %v437_v48 = vpack.c.b16 %v435_v41, %v434_v38  ;;  %v399_v49 = vor.u32 %v398_v42, %v394_v34  ;;  %v404_v50 = vrot.slane %v402_v43, 5  ;;  %v746_v11 = vsel %vm445_vm0, %v642_v9, 0 }
  0x2f   : > { %1190 = vmatmul.msk.bf16.vlgmr.msra.gmra.mxu2 %vm438_vm1, %v535_v45  ;;  %v395_v51 = vsel %vm1401_vm15, %v390_v46, %v394_v34  ;;  %v536_v1 = vpack.c.b16 %v534_v0, %v533_v63  ;;  %755 = vmatpush.bf16.msrb.mxu0 %v746_v11  ;;  %v802_v22 = vsel %vm445_vm0, %v1207_v18, 0  ;;  %v708_v34 = vsel %vm445_vm0, %v1192_v33, 0 }
  0x30   : > { %1176 = vmatmul.msk.bf16.vlgmr.msra.gmra.mxu1 %vm438_vm1, %v437_v48  ;;  %v400_v52 = vrot.slane %v399_v49, 4  ;;  %v432_v56 = vunpack.c.l.b16 %v395_v51  ;;  %717 = vmatpush.bf16.msra.mxu3 %v708_v34  ;;  %v628_v51 = vld [vmem:[#allocation2 + $0x8] sm:$0x1] }
  0x31   : > { %811 = vmatpush.bf16.msra.mxu1 %v802_v22 }
  0x32   : > { %v405_v57 = vsel %vm1401_vm15, %v400_v52, %v404_v50 }
  0x33   : > { %v433_v58 = vunpack.c.l.b16 %v405_v57 }
  0x35   : > { %v436_v62 = vpack.c.b16 %v433_v58, %v432_v56 }
  0x37   : > { %1175 = vmatmul.msk.bf16.vlgmr.msra.gmra.mxu0 %vm438_vm1, %v436_v62 }
  0x3f   : > { %1191 = vmatmul.msk.bf16.gmra.mxu2 %vm438_vm1, %v536_v1 }
  0x40   : > { %1185 = vmatmul.msk.bf16.vlgmr.msrb.gmra.mxu1 %vm438_vm1, %v1232_v2 }
  0x50   : > { %1186 = vmatmul.msk.bf16.gmra.mxu1 %vm438_vm1, %v1233_v60 }
  0xad   : > { %v463_v4 = vpop.f32.mrf.mxu1 }
  0xb2   : > { %v555_v6 = vpop.f32.mrf.mxu2 }
  0xb4   : > { %v458_v8 = vpop.f32.mrf.mxu0 }
  0xb5   : > { %v465_v5 = vpop.f32.mrf.mxu1 }
  0xba   : > { %v557_v24 = vpop.f32.mrf.mxu2 }
  0xbc   : > { %v460_v26 = vpop.f32.mrf.mxu0 }
  0xbd   : > { %v496_v10 = vpop.f32.mrf.mxu1 }
  0xbe   : > { %v497_v14 = vadd.f32 %v496_v10, %v458_v8  ;;  %v631_v8 = vld [vmem:[#allocation2 + $0xc] sm:$0xf] }
  0xc0   : > { %v565_v19 = vadd.f32 %v555_v6, %v497_v14 }
  0xc2   : > { %v573_v23 = vadd.f32 %v1247_v17, %v565_v19  ;;  %v560_v41 = vpop.f32.mrf.mxu2 }
  0xc4   : > { %v577_v25 = vmax.f32 %v573_v23, 0.0 }
  0xc5   : > { %v498_v27 = vpop.f32.mrf.mxu1 }
  0xc6   : > { %v581_v28 = vpack.c.bf16 %v577_v25, %v577_v25  ;;  %v499_v29 = vadd.f32 %v498_v27, %v460_v26 }
  0xc8   : > { %v586_v30 = vshrl.u32 %v581_v28, 16  ;;  %v566_v31 = vadd.f32 %v557_v24, %v499_v29  ;;  %v589_v37 = vshll.u32 %v581_v28, 16 }
  0xca   : > { %v588_v36 = vrot.slane %v586_v30, 7  ;;  %v574_v38 = vadd.f32 %v1247_v17, %v566_v31  ;;  %v562_v62 = vpop.f32.mrf.mxu2 }
  0xcc   : > { %v591_v39 = vor.u32 %v589_v37, %v588_v36  ;;  %v578_v40 = vmax.f32 %v574_v38, 0.0  ;;  %v592_v52 = vrot.slane %v588_v36, 4 }
  0xcd   : > { %v501_v42 = vpop.f32.mrf.mxu1 }
  0xce   : > { %v625_v43 = vsel %vm1368_vm9, %v591_v39, %v1397_v15  ;;  %v582_v44 = vpack.c.bf16 %v578_v40, %v578_v40  ;;  %v502_v45 = vadd.f32 %v501_v42, %v463_v4 }
  0xcf   : > { %626 = vst [vmem:[#allocation2] sm:$0xf] %v625_v43 }
  0xd0   : > { %v594_v46 = vshrl.u32 %v582_v44, 16  ;;  %v567_v47 = vadd.f32 %v560_v41, %v502_v45  ;;  %v597_v49 = vshll.u32 %v582_v44, 16  ;;  %v635_v41 = vld [vmem:[#allocation2 + $0x14] sm:$0x1] }
  0xd2   : > { %v596_v48 = vrot.slane %v594_v46, 7  ;;  %v575_v50 = vadd.f32 %v1247_v17, %v567_v47 }
  0xd4   : > { %v599_v53 = vor.u32 %v597_v49, %v596_v48  ;;  %v601_v54 = vrot.slane %v596_v48, 4  ;;  %v579_v55 = vmax.f32 %v575_v50, 0.0 }
  0xd5   : > { %v503_v56 = vpop.f32.mrf.mxu1 }
  0xd6   : > { %v600_v57 = vsel %vm1362_vm8, %v592_v52, %v599_v53  ;;  %v629_v15 = vsel %vm1311_vm3, %v601_v54, %v628_v51  ;;  %v583_v58 = vpack.c.bf16 %v579_v55, %v579_v55  ;;  %v504_v59 = vadd.f32 %v503_v56, %v465_v5  ;;  %v1453_v61 = vld [vmem:[#allocation2] sm:$0xf] }
  0xd7   : > { %627 = vst.msk [vmem:[#allocation2 + $0x4] sm:$0xf] %vm355_vm7, %v600_v57  ;;  %v646_v63 = vshrl.u32 %v1453_v61, 16  ;;  %v649_v0 = vshll.u32 %v1453_v61, 16  ;;  %v767_v9 = vld [vmem:[#allocation2] sm:$0xe] }
  0xd8   : > { %630 = vst [vmem:[#allocation2 + $0x8] sm:$0x1] %v629_v15  ;;  %v603_v1 = vshrl.u32 %v583_v58, 16  ;;  %v568_v2 = vadd.f32 %v562_v62, %v504_v59  ;;  %v606_v4 = vshll.u32 %v583_v58, 16  ;;  %v1205_v24 = vrot.slane %v767_v9, 9 }
  0xd9   : > { %v648_v10 = vrot.slane %v646_v63, 4  ;;  %v651_v11 = vrot.slane %v649_v0, 5 }
  0xda   : > { %v605_v60 = vrot.slane %v603_v1, 7  ;;  %v576_v6 = vadd.f32 %v1247_v17, %v568_v2 }
  0xdb   : > { %v652_v27 = vor.u32 %v651_v11, %v648_v10 }
  0xdc   : > { %v608_v5 = vor.u32 %v606_v4, %v605_v60  ;;  %v580_v14 = vmax.f32 %v576_v6, 0.0  ;;  %v609_v40 = vrot.slane %v605_v60, 4 }
  0xdd   : > { %v653_v44 = vrot.slane %v652_v27, 4 }
  0xde   : > { %v632_v18 = vsel %vm1368_vm9, %v608_v5, %v631_v8  ;;  %v584_v19 = vpack.c.bf16 %v580_v14, %v580_v14  ;;  %v1234_v22 = vld [vmem:[#allocation2] sm:$0xff] }
  0xdf   : > { %v639_v23 = vld [vmem:[#allocation2 + $0x4] sm:$0xf]  ;;  %633 = vst [vmem:[#allocation2 + $0xc] sm:$0xf] %v632_v18  ;;  %v643_v25 = vld [vmem:[#allocation2 + $0x8] sm:$0x1]  ;;  %1203 = vmatmul.msk.bf16.vlgmr.msrb.gmra.mxu0 %vm438_vm1, %v1234_v22 }
  0xe0   : > { %v775_v26 = vrot.slane %v639_v23, 5  ;;  %v655_v28 = vshll.u32 %v639_v23, 16  ;;  %v611_v29 = vshrl.u32 %v584_v19, 16  ;;  %v778_v17 = vrot.slane %v643_v25, 5 }
  0xe1   : > { %v659_v30 = vshrl.u32 %v639_v23, 16  ;;  %v665_v36 = vshll.u32 %v643_v25, 16  ;;  %v614_v38 = vshll.u32 %v584_v19, 16 }
  0xe2   : > { %v776_v31 = vsel %vm1393_vm14, %v1205_v24, %v775_v26  ;;  %v777_v33 = vrot.slane %v775_v26, 4  ;;  %v657_v34 = vrot.slane %v655_v28, 5  ;;  %v613_v37 = vrot.slane %v611_v29, 7 }
  0xe3   : > { %v661_v39 = vrot.slane %v659_v30, 4  ;;  %v789_v43 = vunpack.c.l.b16 %v776_v31  ;;  %v667_v50 = vrot.slane %v665_v36, 5 }
  0xe4   : > { %v779_v42 = vsel %vm1393_vm14, %v777_v33, %v778_v17  ;;  %v616_v45 = vor.u32 %v614_v38, %v613_v37  ;;  %v618_v46 = vrot.slane %v613_v37, 4  ;;  %v658_v49 = vsel %vm1401_vm15, %v653_v44, %v657_v34 }
  0xe5   : > { %v790_v47 = vunpack.c.l.b16 %v779_v42  ;;  %v662_v48 = vor.u32 %v661_v39, %v657_v34  ;;  %v695_v58 = vunpack.c.l.b16 %v658_v49  ;;  %v1210_v39 = vld [vmem:[%s1561_s3 + $0x2] sm:$0x3] }
  0xe6   : > { %v617_v51 = vsel %vm1362_vm8, %v609_v40, %v616_v45  ;;  %v636_v52 = vsel %vm1311_vm3, %v618_v46, %v635_v41  ;;  %v640_v55 = vld [vmem:[#allocation2 + $0xc] sm:$0xf]  ;;  %v900_v40 = vld [vmem:[%s1561_s3] sm:$0x3]  ;;  %v966_v42 = vsel %vm445_vm0, %v1210_v39, 0 }
  0xe7   : > { %v793_v53 = vpack.c.b16 %v790_v47, %v789_v43  ;;  %v663_v54 = vrot.slane %v662_v48, 4  ;;  %634 = vst.msk [vmem:[#allocation2 + $0x10] sm:$0xf] %vm355_vm7, %v617_v51  ;;  %v670_v56 = vshrl.u32 %v640_v55, 16  ;;  %v673_v57 = vshll.u32 %v640_v55, 16  ;;  %975 = vmatpush.bf16.msrb.mxu2 %v966_v42 }
  0xe8   : > { %637 = vst [vmem:[#allocation2 + $0x14] sm:$0x1] %v636_v52  ;;  %v768_v63 = vld [vmem:[#allocation2 + $0xc] sm:$0xe]  ;;  %v1004_v43 = vsel %vm445_vm0, %v900_v40, 0 }
  0xe9   : > { %1208 = vmatmul.msk.bf16.vlgmr.msra.gmra.mxu1 %vm438_vm1, %v793_v53  ;;  %v668_v15 = vsel %vm1401_vm15, %v663_v54, %v667_v50  ;;  %v672_v0 = vrot.slane %v670_v56, 4  ;;  %v675_v1 = vrot.slane %v673_v57, 5  ;;  %v1206_v4 = vrot.slane %v768_v63, 9  ;;  %1013 = vmatpush.bf16.msrb.mxu3 %v1004_v43  ;;  %v1248_v46 = vld [vmem:[%s1563_s5] ss:$0 sm:$0xff] }
  0xea   : > { %v696_v59 = vunpack.c.l.b16 %v668_v15  ;;  %v1225_v47 = vld [vmem:[%s1561_s3 + $0x4] sm:$0x3] }
  0xeb   : > { %v676_v9 = vor.u32 %v675_v1, %v672_v0  ;;  %v1060_v49 = vsel %vm445_vm0, %v1225_v47, 0 }
  0xec   : > { %v699_v62 = vpack.c.b16 %v696_v59, %v695_v58  ;;  %1069 = vmatpush.bf16.msra.mxu0 %v1060_v49 }
  0xed   : > { %v677_v25 = vrot.slane %v676_v9, 4 }
  0xee   : > { %1193 = vmatmul.msk.bf16.vlgmr.msra.gmra.mxu3 %vm438_vm1, %v699_v62  ;;  %v1235_v2 = vld [vmem:[#allocation2 + $0xc] sm:$0xff] }
  0xef   : > { %v641_v60 = vld [vmem:[#allocation2 + $0x10] sm:$0xf]  ;;  %v644_v6 = vld [vmem:[#allocation2 + $0x14] sm:$0x1]  ;;  %1204 = vmatmul.msk.bf16.gmra.mxu0 %vm438_vm1, %v1235_v2 }
  0xf0   : > { %v782_v8 = vrot.slane %v641_v60, 5  ;;  %v679_v10 = vshll.u32 %v641_v60, 16  ;;  %v683_v11 = vshrl.u32 %v641_v60, 16  ;;  %v785_v5 = vrot.slane %v644_v6, 5 }
  0xf1   : > { %v689_v14 = vshll.u32 %v644_v6, 16 }
  0xf2   : > { %v783_v18 = vsel %vm1393_vm14, %v1206_v4, %v782_v8  ;;  %v784_v19 = vrot.slane %v782_v8, 4  ;;  %v681_v22 = vrot.slane %v679_v10, 5  ;;  %v685_v23 = vrot.slane %v683_v11, 4 }
  0xf3   : > { %v791_v27 = vunpack.c.l.b16 %v783_v18  ;;  %v691_v30 = vrot.slane %v689_v14, 5 }
  0xf4   : > { %v786_v24 = vsel %vm1393_vm14, %v784_v19, %v785_v5  ;;  %v686_v26 = vor.u32 %v685_v23, %v681_v22  ;;  %v682_v29 = vsel %vm1401_vm15, %v677_v25, %v681_v22  ;;  %v886_v25 = vld [vmem:[#allocation2 + $0x8] sm:$0x1] }
  0xf5   : > { %v792_v28 = vunpack.c.l.b16 %v786_v24  ;;  %v697_v34 = vunpack.c.l.b16 %v682_v29 }
  0xf6   : > { %v687_v17 = vrot.slane %v686_v26, 4 }
  0xf7   : > { %v794_v31 = vpack.c.b16 %v792_v28, %v791_v27 }
  0xf8   : > { %v692_v33 = vsel %vm1401_vm15, %v687_v17, %v691_v30 }
  0xf9   : > { %1209 = vmatmul.msk.bf16.gmra.mxu1 %vm438_vm1, %v794_v31  ;;  %v698_v36 = vunpack.c.l.b16 %v692_v33 }
  0xfb   : > { %v700_v37 = vpack.c.b16 %v698_v36, %v697_v34 }
  0xfe   : > { %1194 = vmatmul.msk.bf16.gmra.mxu3 %vm438_vm1, %v700_v37 }
 0x15c   : > { %v757_v38 = vpop.f32.mrf.mxu0 }
 0x164   : > { %v759_v50 = vpop.f32.mrf.mxu0 }
 0x166   : > { %v813_v41 = vpop.f32.mrf.mxu1 }
 0x16c   : > { %v762_v63 = vpop.f32.mrf.mxu0 }
 0x16e   : > { %v815_v52 = vpop.f32.mrf.mxu1 }
 0x171   : > { %v719_v44 = vpop.f32.mrf.mxu3 }
 0x172   : > { %v758_v45 = vadd.f32 %v757_v38, %v719_v44 }
 0x174   : > { %v823_v48 = vadd.f32 %v813_v41, %v758_v45  ;;  %v764_v24 = vpop.f32.mrf.mxu0  ;;  %v889_v45 = vld [vmem:[#allocation2 + $0xc] sm:$0xf] }
 0x176   : > { %v831_v51 = vadd.f32 %v1248_v46, %v823_v48  ;;  %v818_v2 = vpop.f32.mrf.mxu1 }
 0x178   : > { %v835_v53 = vmax.f32 %v831_v51, 0.0 }
 0x179   : > { %v721_v54 = vpop.f32.mrf.mxu3 }
 0x17a   : > { %v839_v55 = vpack.c.bf16 %v835_v53, %v835_v53  ;;  %v760_v56 = vadd.f32 %v759_v50, %v721_v54 }
 0x17c   : > { %v844_v57 = vshrl.u32 %v839_v55, 16  ;;  %v824_v15 = vadd.f32 %v815_v52, %v760_v56  ;;  %v847_v59 = vshll.u32 %v839_v55, 16 }
 0x17e   : > { %v846_v58 = vrot.slane %v844_v57, 7  ;;  %v832_v62 = vadd.f32 %v1248_v46, %v824_v15  ;;  %v820_v30 = vpop.f32.mrf.mxu1 }
 0x180   : > { %v849_v0 = vor.u32 %v847_v59, %v846_v58  ;;  %v836_v1 = vmax.f32 %v832_v62, 0.0  ;;  %v850_v18 = vrot.slane %v846_v58, 4 }
 0x181   : > { %v724_v60 = vpop.f32.mrf.mxu3 }
 0x182   : > { %v883_v4 = vsel %vm1368_vm9, %v849_v0, %v1453_v61  ;;  %v840_v6 = vpack.c.bf16 %v836_v1, %v836_v1  ;;  %v763_v8 = vadd.f32 %v762_v63, %v724_v60 }
 0x183   : > { %884 = vst [vmem:[#allocation2] sm:$0xf] %v883_v4 }
 0x184   : > { %v852_v9 = vshrl.u32 %v840_v6, 16  ;;  %v825_v10 = vadd.f32 %v818_v2, %v763_v8  ;;  %v855_v5 = vshll.u32 %v840_v6, 16 }
 0x186   : > { %v854_v11 = vrot.slane %v852_v9, 7  ;;  %v833_v14 = vadd.f32 %v1248_v46, %v825_v10 }
 0x188   : > { %v857_v19 = vor.u32 %v855_v5, %v854_v11  ;;  %v859_v22 = vrot.slane %v854_v11, 4  ;;  %v837_v23 = vmax.f32 %v833_v14, 0.0  ;;  %v893_v11 = vld [vmem:[#allocation2 + $0x14] sm:$0x1] }
 0x189   : > { %v726_v26 = vpop.f32.mrf.mxu3 }
 0x18a   : > { %v858_v27 = vsel %vm1362_vm8, %v850_v18, %v857_v19  ;;  %v887_v61 = vsel %vm1311_vm3, %v859_v22, %v886_v25  ;;  %v841_v28 = vpack.c.bf16 %v837_v23, %v837_v23  ;;  %v765_v29 = vadd.f32 %v764_v24, %v726_v26  ;;  %v896_v17 = vld [vmem:[#allocation2] sm:$0xf] }
 0x18b   : > { %885 = vst.msk [vmem:[#allocation2 + $0x4] sm:$0xf] %vm355_vm7, %v858_v27  ;;  %v904_v31 = vshrl.u32 %v896_v17, 16  ;;  %v907_v33 = vshll.u32 %v896_v17, 16  ;;  %v1025_v40 = vld [vmem:[#allocation2] sm:$0xe] }
 0x18c   : > { %888 = vst [vmem:[#allocation2 + $0x8] sm:$0x1] %v887_v61  ;;  %v861_v34 = vshrl.u32 %v841_v28, 16  ;;  %v826_v36 = vadd.f32 %v820_v30, %v765_v29  ;;  %v864_v38 = vshll.u32 %v841_v28, 16  ;;  %v1223_v51 = vrot.slane %v1025_v40, 9 }
 0x18d   : > { %v906_v41 = vrot.slane %v904_v31, 4  ;;  %v909_v42 = vrot.slane %v907_v33, 5 }
 0x18e   : > { %v863_v37 = vrot.slane %v861_v34, 7  ;;  %v834_v39 = vadd.f32 %v1248_v46, %v826_v36 }
 0x18f   : > { %v910_v54 = vor.u32 %v909_v42, %v906_v41 }
 0x190   : > { %v866_v43 = vor.u32 %v864_v38, %v863_v37  ;;  %v838_v44 = vmax.f32 %v834_v39, 0.0  ;;  %v867_v1 = vrot.slane %v863_v37, 4 }
 0x191   : > { %v911_v4 = vrot.slane %v910_v54, 4 }
 0x192   : > { %v890_v47 = vsel %vm1368_vm9, %v866_v43, %v889_v45  ;;  %v842_v48 = vpack.c.bf16 %v838_v44, %v838_v44  ;;  %v1236_v49 = vld [vmem:[#allocation2] sm:$0xff] }
 0x193   : > { %v897_v50 = vld [vmem:[#allocation2 + $0x4] sm:$0xf]  ;;  %891 = vst [vmem:[#allocation2 + $0xc] sm:$0xf] %v890_v47  ;;  %v901_v52 = vld [vmem:[#allocation2 + $0x8] sm:$0x1]  ;;  %1221 = vmatmul.msk.bf16.vlgmr.msrb.gmra.mxu3 %vm438_vm1, %v1236_v49 }
 0x194   : > { %v1033_v53 = vrot.slane %v897_v50, 5  ;;  %v913_v55 = vshll.u32 %v897_v50, 16  ;;  %v869_v56 = vshrl.u32 %v842_v48, 16  ;;  %v1036_v46 = vrot.slane %v901_v52, 5 }
 0x195   : > { %v917_v57 = vshrl.u32 %v897_v50, 16  ;;  %v923_v59 = vshll.u32 %v901_v52, 16  ;;  %v872_v63 = vshll.u32 %v842_v48, 16 }
 0x196   : > { %v1034_v15 = vsel %vm1393_vm14, %v1223_v51, %v1033_v53  ;;  %v1035_v58 = vrot.slane %v1033_v53, 4  ;;  %v915_v35 = vrot.slane %v913_v55, 5  ;;  %v871_v62 = vrot.slane %v869_v56, 7 }
 0x197   : > { %v919_v0 = vrot.slane %v917_v57, 4  ;;  %v1047_v60 = vunpack.c.l.b16 %v1034_v15  ;;  %v925_v14 = vrot.slane %v923_v59, 5 }
 0x198   : > { %v1037_v2 = vsel %vm1393_vm14, %v1035_v58, %v1036_v46  ;;  %v874_v6 = vor.u32 %v872_v63, %v871_v62  ;;  %v876_v8 = vrot.slane %v871_v62, 4  ;;  %v916_v5 = vsel %vm1401_vm15, %v911_v4, %v915_v35  ;;  %v1249_v62 = vld [vmem:[%s1564_s6] ss:$0 sm:$0xff] }
 0x199   : > { %v1048_v9 = vunpack.c.l.b16 %v1037_v2  ;;  %v920_v10 = vor.u32 %v919_v0, %v915_v35  ;;  %v953_v61 = vunpack.c.l.b16 %v916_v5 }
 0x19a   : > { %v875_v18 = vsel %vm1362_vm8, %v867_v1, %v874_v6  ;;  %v894_v19 = vsel %vm1311_vm3, %v876_v8, %v893_v11  ;;  %v898_v24 = vld [vmem:[#allocation2 + $0xc] sm:$0xf] }
 0x19b   : > { %v1051_v22 = vpack.c.b16 %v1048_v9, %v1047_v60  ;;  %v921_v23 = vrot.slane %v920_v10, 4  ;;  %892 = vst.msk [vmem:[#allocation2 + $0x10] sm:$0xf] %vm355_vm7, %v875_v18  ;;  %v928_v25 = vshrl.u32 %v898_v24, 16  ;;  %v931_v26 = vshll.u32 %v898_v24, 16 }
 0x19c   : > { %895 = vst [vmem:[#allocation2 + $0x14] sm:$0x1] %v894_v19  ;;  %v1026_v29 = vld [vmem:[#allocation2 + $0xc] sm:$0xe] }
 0x19d   : > { %1226 = vmatmul.msk.bf16.vlgmr.msra.gmra.mxu0 %vm438_vm1, %v1051_v22  ;;  %v926_v27 = vsel %vm1401_vm15, %v921_v23, %v925_v14  ;;  %v930_v17 = vrot.slane %v928_v25, 4  ;;  %v933_v3 = vrot.slane %v931_v26, 5  ;;  %v1224_v33 = vrot.slane %v1026_v29, 9 }
 0x19e   : > { %v954_v28 = vunpack.c.l.b16 %v926_v27 }
 0x19f   : > { %v934_v37 = vor.u32 %v933_v3, %v930_v17 }
 0x1a0   : > { %v957_v32 = vpack.c.b16 %v954_v28, %v953_v61 }
 0x1a1   : > { %v935_v48 = vrot.slane %v934_v37, 4 }
 0x1a2   : > { %1211 = vmatmul.msk.bf16.vlgmr.msrb.gmra.mxu2 %vm438_vm1, %v957_v32  ;;  %v1237_v30 = vld [vmem:[#allocation2 + $0xc] sm:$0xff] }
 0x1a3   : > { %v899_v31 = vld [vmem:[#allocation2 + $0x10] sm:$0xf]  ;;  %v902_v34 = vld [vmem:[#allocation2 + $0x14] sm:$0x1]  ;;  %1222 = vmatmul.msk.bf16.gmra.mxu3 %vm438_vm1, %v1237_v30 }
 0x1a4   : > { %v1040_v36 = vrot.slane %v899_v31, 5  ;;  %v937_v38 = vshll.u32 %v899_v31, 16  ;;  %v941_v39 = vshrl.u32 %v899_v31, 16  ;;  %v1043_v40 = vrot.slane %v902_v34, 5 }
 0x1a5   : > { %v947_v41 = vshll.u32 %v902_v34, 16 }
 0x1a6   : > { %v1041_v42 = vsel %vm1393_vm14, %v1224_v33, %v1040_v36  ;;  %v1042_v43 = vrot.slane %v1040_v36, 4  ;;  %v939_v44 = vrot.slane %v937_v38, 5  ;;  %v943_v45 = vrot.slane %v941_v39, 4 }
 0x1a7   : > { %v1049_v50 = vunpack.c.l.b16 %v1041_v42  ;;  %v949_v54 = vrot.slane %v947_v41, 5 }
 0x1a8   : > { %v1044_v47 = vsel %vm1393_vm14, %v1042_v43, %v1043_v40  ;;  %v944_v49 = vor.u32 %v943_v45, %v939_v44  ;;  %v940_v52 = vsel %vm1401_vm15, %v935_v48, %v939_v44 }
 0x1a9   : > { %v1050_v51 = vunpack.c.l.b16 %v1044_v47  ;;  %v955_v46 = vunpack.c.l.b16 %v940_v52 }
 0x1aa   : > { %v945_v53 = vrot.slane %v944_v49, 4 }
 0x1ab   : > { %v1052_v55 = vpack.c.b16 %v1050_v51, %v1049_v50 }
 0x1ac   : > { %v950_v56 = vsel %vm1401_vm15, %v945_v53, %v949_v54 }
 0x1ad   : > { %1227 = vmatmul.msk.bf16.gmra.mxu0 %vm438_vm1, %v1052_v55  ;;  %v956_v57 = vunpack.c.l.b16 %v950_v56 }
 0x1af   : > { %v958_v7 = vpack.c.b16 %v956_v57, %v955_v46 }
 0x1b2   : > { %1212 = vmatmul.msk.bf16.gmra.mxu2 %vm438_vm1, %v958_v7 }
 0x216   : > { %v1015_v15 = vpop.f32.mrf.mxu3 }
 0x21a   : > { %v1071_v58 = vpop.f32.mrf.mxu0 }
 0x21e   : > { %v1017_v0 = vpop.f32.mrf.mxu3 }
 0x222   : > { %v1073_v1 = vpop.f32.mrf.mxu0 }
 0x225   : > { %v977_v35 = vpop.f32.mrf.mxu2 }
 0x226   : > { %v1016_v59 = vadd.f32 %v1015_v15, %v977_v35  ;;  %v1020_v10 = vpop.f32.mrf.mxu3 }
 0x228   : > { %v1081_v63 = vadd.f32 %v1071_v58, %v1016_v59 }
 0x22a   : > { %v1089_v16 = vadd.f32 %v1249_v62, %v1081_v63  ;;  %v1076_v5 = vpop.f32.mrf.mxu0 }
 0x22c   : > { %v1093_v2 = vadd.f32 %v1089_v16, %v1352_v20 }
 0x22d   : > { %v979_v60 = vpop.f32.mrf.mxu2 }
 0x22e   : > { %v1097_v4 = vmax.f32 %v1093_v2, 0.0  ;;  %v1018_v6 = vadd.f32 %v1017_v0, %v979_v60  ;;  %v1022_v24 = vpop.f32.mrf.mxu3 }
 0x230   : > { %1101 = vst.msk [vmem:[%s285_s14] sm:$0xff] %vm438_vm1, %v1097_v4  ;;  %v1082_v8 = vadd.f32 %v1073_v1, %v1018_v6 }
 0x232   : > { %v1090_v9 = vadd.f32 %v1249_v62, %v1082_v8  ;;  %v1078_v61 = vpop.f32.mrf.mxu0 }
 0x234   : > { %v1094_v11 = vadd.f32 %v1090_v9, %v1354_v21 }
 0x235   : > { %v982_v14 = vpop.f32.mrf.mxu2 }
 0x236   : > { %v1098_v18 = vmax.f32 %v1094_v11, 0.0  ;;  %v1021_v19 = vadd.f32 %v1020_v10, %v982_v14 }
 0x238   : > { %1102 = vst.msk [vmem:[%s285_s14 + $0x8] sm:$0xff] %vm438_vm1, %v1098_v18  ;;  %v1083_v20 = vadd.f32 %v1076_v5, %v1021_v19 }
 0x23a   : > { %v1091_v22 = vadd.f32 %v1249_v62, %v1083_v20 }
 0x23c   : > { %v1095_v23 = vadd.f32 %v1091_v22, %v1337_v12 }
 0x23d   : > { %v984_v25 = vpop.f32.mrf.mxu2 }
 0x23e   : > { %v1099_v26 = vmax.f32 %v1095_v23, 0.0  ;;  %v1023_v27 = vadd.f32 %v1022_v24, %v984_v25 }
 0x240   : > { %1103 = vst.msk [vmem:[%s285_s14 + $0x10] sm:$0xff] %vm438_vm1, %v1099_v26  ;;  %v1084_v28 = vadd.f32 %v1078_v61, %v1023_v27 }
 0x242   : > { %v1092_v32 = vadd.f32 %v1249_v62, %v1084_v28 }
 0x244   : > { %v1096_v21 = vadd.f32 %v1092_v32, %v1339_v13 }
 0x246   : > { %v1100_v29 = vmax.f32 %v1096_v21, 0.0 }
 0x248   : > { %1104 = vst.msk [vmem:[%s285_s14 + $0x18] sm:$0xff] %vm438_vm1, %v1100_v29 }
 0x249 PF: > { %s17_s24 = sadd.s32 1, %s1256_s24  }
 0x24a   : > { %p14_p4 = scmp.ge.s32.totalorder %s17_s24, 4  }
 0x24c   :  { %16 = sbr.rel (!%p14_p4) target bundleno = 1 (0x1), region = 84 }

</bundles_post_ra>
